<compile_context>
chip_gen: v6e
topology: v6e:2x2x1
jax: 0.10.0
libtpu: 0.0.40
codegen_flags: <defaults>
</compile_context>

<pallas_src>
import jax
import jax.numpy as jnp
from jax.experimental import pallas as pl
from jax.experimental.pallas import tpu as pltpu


def _decoder_seq_kernel(x_ref, h0_ref, c0_ref,
                        w_ref, b_ref, wout_ref, bout_ref,
                        out_ref, state_ref,
                        h_sc, c_sc):
    t = pl.program_id(0)

    # Initialize the carried state from the provided (h0, c0) on the first step.
    @pl.when(t == 0)
    def _():
        h_sc[...] = h0_ref[...]
        c_sc[...] = c0_ref[...]

    x = x_ref[...]            # (B, n_in_out)  (timestep dim squeezed)
    h = h_sc[...]             # (B, H)
    c = c_sc[...]             # (B, H)
    H = h.shape[-1]

    # Single fused gate matmul: [x | h] @ [Wih_t; Whh_t] + (b_ih + b_hh)
    xh = jnp.concatenate([x, h], axis=-1)                      # (B, n_in_out + H)
    gates = (jnp.dot(xh, w_ref[...], preferred_element_type=jnp.float32)
             + b_ref[...])                                     # (B, 4H)

    # Full-vreg-width activation passes, then 32-lane slices of the results.
    sig = jax.nn.sigmoid(gates)
    th = jnp.tanh(gates)
    i_g = sig[:, 0 * H:1 * H]
    f_g = sig[:, 1 * H:2 * H]
    o_g = sig[:, 3 * H:4 * H]
    g_g = th[:, 2 * H:3 * H]

    c_new = f_g * c + i_g * g_g
    h_new = o_g * jnp.tanh(c_new)

    # out = h' @ W_out^T + b_out ; residual add with x
    out = (jnp.dot(h_new, wout_ref[...], preferred_element_type=jnp.float32)
           + bout_ref[...])
    out_ref[...] = out + x

    # Carry state in VMEM scratch across grid steps.
    h_sc[...] = h_new
    c_sc[...] = c_new

    # Single packed [h | c] writeback at the last step (one HBM store).
    @pl.when(t == pl.num_programs(0) - 1)
    def _():
        state_ref[...] = jnp.concatenate([h_new, c_new], axis=-1)


def residual_rnn_decoder_seq(xs, h0, c0, params):
    """Runs the module forward over a whole sequence in one pallas_call.

    xs: (T, B, n_in_out); h0, c0: (B, n_hidden)
    Returns (outs, ress, h_new, c_new) where outs[t] == module(xs[t]) output
    with hidden state carried across t, and ress == xs (the residuals).
    """
    T, B, n_in_out = xs.shape
    H = h0.shape[-1]

    w_cat = params['w_cat']                    # (n_in_out + H, 4H)
    b_cat = params['b_cat'].reshape(1, -1)     # (1, 4H)
    wout_t = params['wout_t']                  # (H, n_in_out)
    bout = params['bout'].reshape(1, -1)       # (1, n_in_out)

    flops_per_step = (2 * B * (n_in_out + H) * 4 * H      # gate matmul
                      + 2 * B * H * n_in_out              # output matmul
                      + 10 * B * H)                       # elementwise gate math
    cost = pl.CostEstimate(
        flops=T * flops_per_step,
        transcendentals=T * B * 9 * H,                    # sigmoid/tanh passes
        bytes_accessed=4 * (2 * xs.size + w_cat.size + wout_t.size
                            + b_cat.size + bout.size + 4 * B * H),
    )

    grid_spec = pltpu.PrefetchScalarGridSpec(
        num_scalar_prefetch=0,
        grid=(T,),
        in_specs=[
            pl.BlockSpec((None, B, n_in_out), lambda t: (t, 0, 0)),  # x_t (per step)
            pl.BlockSpec((B, H), lambda t: (0, 0)),                  # h0 (resident)
            pl.BlockSpec((B, H), lambda t: (0, 0)),                  # c0 (resident)
            pl.BlockSpec(w_cat.shape, lambda t: (0, 0)),             # fused gate W
            pl.BlockSpec(b_cat.shape, lambda t: (0, 0)),             # fused gate b
            pl.BlockSpec(wout_t.shape, lambda t: (0, 0)),            # output W
            pl.BlockSpec(bout.shape, lambda t: (0, 0)),              # output b
        ],
        out_specs=(
            pl.BlockSpec((None, B, n_in_out), lambda t: (t, 0, 0)),  # out+res per step
            pl.BlockSpec((B, 2 * H), lambda t: (0, 0)),              # packed [h | c]
        ),
        scratch_shapes=[
            pltpu.VMEM((B, H), jnp.float32),   # h carry
            pltpu.VMEM((B, H), jnp.float32),   # c carry
        ],
    )

    outs, state = pl.pallas_call(
        _decoder_seq_kernel,
        out_shape=(jax.ShapeDtypeStruct((T, B, n_in_out), jnp.float32),
                   jax.ShapeDtypeStruct((B, 2 * H), jnp.float32)),
        grid_spec=grid_spec,
        compiler_params=pltpu.CompilerParams(
            dimension_semantics=("arbitrary",)),   # time axis carries state
        cost_estimate=cost,
    )(xs, h0, c0, w_cat, b_cat, wout_t, bout)

    h_new = state[:, :H]
    c_new = state[:, H:]
    # res == x unchanged: return the input directly, no kernel writeback needed.
    return outs, xs, h_new, c_new


def residual_rnn_decoder(x, h, c, params):
    """Single module forward (x: (B, n_in_out) or (B, 1, n_in_out))."""
    if x.ndim == 3:
        x = jnp.squeeze(x, axis=1)
    elif x.ndim != 2:
        raise TypeError('invalid shape of tensor.')
    outs, _, h_new, c_new = residual_rnn_decoder_seq(x[None], h, c, params)
    return outs[0], x, h_new, c_new


def init_params(key, n_in_out, n_hidden):
    """Mirrors PyTorch's U(-1/sqrt(H), 1/sqrt(H)) init; stores fused/transposed weights."""
    k = 1.0 / jnp.sqrt(jnp.float32(n_hidden))
    keys = jax.random.split(key, 6)
    u = lambda kk, shape: jax.random.uniform(kk, shape, jnp.float32, -k, k)
    wih_t = u(keys[0], (n_in_out, 4 * n_hidden))     # (in, 4H), pre-transposed
    whh_t = u(keys[1], (n_hidden, 4 * n_hidden))     # (H, 4H), pre-transposed
    bih = u(keys[2], (4 * n_hidden,))
    bhh = u(keys[3], (4 * n_hidden,))
    return {
        'w_cat': jnp.concatenate([wih_t, whh_t], axis=0),   # (in + H, 4H)
        'b_cat': bih + bhh,                                  # (4H,)
        'wout_t': u(keys[4], (n_hidden, n_in_out)),          # (H, in)
        'bout':   u(keys[5], (n_in_out,)),
    }


def _step_ref(params, h, c, x):
    H = h.shape[-1]
    gates = (jnp.concatenate([x, h], axis=-1) @ params['w_cat']
             + params['b_cat'][None, :])
    i_g = jax.nn.sigmoid(gates[:, 0 * H:1 * H])
    f_g = jax.nn.sigmoid(gates[:, 1 * H:2 * H])
    g_g = jnp.tanh(gates[:, 2 * H:3 * H])
    o_g = jax.nn.sigmoid(gates[:, 3 * H:4 * H])
    c_new = f_g * c + i_g * g_g
    h_new = o_g * jnp.tanh(c_new)
    out = h_new @ params['wout_t'] + params['bout'][None, :]
    return out + x, h_new, c_new


def reference_seq(xs, h0, c0, params):
    """Pure-JAX reference: scan of the per-step module forward."""
    def body(carry, x):
        h, c = carry
        out, h, c = _step_ref(params, h, c, x)
        return (h, c), out
    (h, c), outs = jax.lax.scan(body, (h0, c0), xs)
    return outs, xs, h, c


if __name__ == "__main__":
    B, n_in_out, n_hidden, T = 2, 16, 32, 8

    key = jax.random.PRNGKey(0)
    k_x, k_p = jax.random.split(key)

    params = init_params(k_p, n_in_out, n_hidden)

    xs = jax.random.normal(k_x, (T, B, n_in_out), jnp.float32)
    # init_hidden -> zeros
    h0 = jnp.zeros((B, n_hidden), jnp.float32)
    c0 = jnp.zeros((B, n_hidden), jnp.float32)

    # Fused sequence decode (T module-forwards in one kernel launch).
    outs, ress, h_new, c_new = residual_rnn_decoder_seq(xs, h0, c0, params)
    jax.block_until_ready((outs, h_new, c_new))

    r_outs, r_ress, r_h, r_c = reference_seq(xs, h0, c0, params)
    assert jnp.allclose(outs, r_outs, atol=1e-5, rtol=1e-5)
    assert jnp.allclose(ress, r_ress, atol=1e-5, rtol=1e-5)
    assert jnp.allclose(h_new, r_h, atol=1e-5, rtol=1e-5)
    assert jnp.allclose(c_new, r_c, atol=1e-5, rtol=1e-5)

    # Single module forward; input may be (B, 1, n_in_out), module squeezes dim 1.
    x1 = xs[0][:, None, :]
    out1, res1, h1, c1 = residual_rnn_decoder(x1, h0, c0, params)
    jax.block_until_ready((out1, h1, c1))
    assert jnp.allclose(out1, r_outs[0], atol=1e-5, rtol=1e-5)
    assert jnp.allclose(res1, xs[0], atol=1e-5, rtol=1e-5)

    print("KERNEL_OK")
</pallas_src>

<mosaic_0001>
module attributes {stable_mosaic.version = 11 : i64} {
  func.func @_decoder_seq_kernel(%arg0: i32, %arg1: memref<1x2x16xf32, #tpu.memory_space<vmem>>, %arg2: memref<2x32xf32, #tpu.memory_space<vmem>>, %arg3: memref<2x32xf32, #tpu.memory_space<vmem>>, %arg4: memref<48x128xf32, #tpu.memory_space<vmem>>, %arg5: memref<1x128xf32, #tpu.memory_space<vmem>>, %arg6: memref<32x16xf32, #tpu.memory_space<vmem>>, %arg7: memref<1x16xf32, #tpu.memory_space<vmem>>, %arg8: memref<1x2x16xf32, #tpu.memory_space<vmem>>, %arg9: memref<2x64xf32, #tpu.memory_space<vmem>>, %arg10: memref<2x32xf32, #tpu.memory_space<vmem>>, %arg11: memref<2x32xf32, #tpu.memory_space<vmem>>) attributes {dimension_semantics = [#tpu.dimension_semantics<arbitrary>], iteration_bounds = array<i64: 8>, scalar_prefetch = 0 : i64, scratch_operands = 2 : i64, tpu.core_type = #tpu.core_type<tc>, window_params = [{transform_indices = @transform_0, window_bounds = array<i64: 1, 2, 16>}, {pipeline_mode = #tpu.pipeline_mode<synchronous>, transform_indices = @transform_1, window_bounds = array<i64: 2, 32>}, {pipeline_mode = #tpu.pipeline_mode<synchronous>, transform_indices = @transform_2, window_bounds = array<i64: 2, 32>}, {pipeline_mode = #tpu.pipeline_mode<synchronous>, transform_indices = @transform_3, window_bounds = array<i64: 48, 128>}, {pipeline_mode = #tpu.pipeline_mode<synchronous>, transform_indices = @transform_4, window_bounds = array<i64: 1, 128>}, {pipeline_mode = #tpu.pipeline_mode<synchronous>, transform_indices = @transform_5, window_bounds = array<i64: 32, 16>}, {pipeline_mode = #tpu.pipeline_mode<synchronous>, transform_indices = @transform_6, window_bounds = array<i64: 1, 16>}, {transform_indices = @transform_7, window_bounds = array<i64: 1, 2, 16>}, {pipeline_mode = #tpu.pipeline_mode<synchronous>, transform_indices = @transform_8, window_bounds = array<i64: 2, 64>}]} {
    %c0_i32 = arith.constant 0 : i32
    %0 = arith.cmpi eq, %arg0, %c0_i32 : i32
    %1 = arith.extui %0 : i1 to i32
    %c0_i32_0 = arith.constant 0 : i32
    %2 = arith.cmpi ne, %1, %c0_i32_0 : i32
    scf.if %2 {
      %c0_25 = arith.constant 0 : index
      %c0_26 = arith.constant 0 : index
      %42 = vector.load %arg2[%c0_25, %c0_26] : memref<2x32xf32, #tpu.memory_space<vmem>>, vector<2x32xf32>
      %c0_27 = arith.constant 0 : index
      %c0_28 = arith.constant 0 : index
      %43 = vector.load %arg10[%c0_27, %c0_28] : memref<2x32xf32, #tpu.memory_space<vmem>>, vector<2x32xf32>
      tpu.vector_store %arg10[%c0_27, %c0_28], %42 {strides = array<i32>} : memref<2x32xf32, #tpu.memory_space<vmem>>, vector<2x32xf32>,
      %c0_29 = arith.constant 0 : index
      %c0_30 = arith.constant 0 : index
      %44 = vector.load %arg3[%c0_29, %c0_30] : memref<2x32xf32, #tpu.memory_space<vmem>>, vector<2x32xf32>
      %c0_31 = arith.constant 0 : index
      %c0_32 = arith.constant 0 : index
      %45 = vector.load %arg11[%c0_31, %c0_32] : memref<2x32xf32, #tpu.memory_space<vmem>>, vector<2x32xf32>
      tpu.vector_store %arg11[%c0_31, %c0_32], %44 {strides = array<i32>} : memref<2x32xf32, #tpu.memory_space<vmem>>, vector<2x32xf32>,
    } else {
    }
    %c0 = arith.constant 0 : index
    %c0_1 = arith.constant 0 : index
    %c0_2 = arith.constant 0 : index
    %3 = vector.load %arg1[%c0, %c0_1, %c0_2] : memref<1x2x16xf32, #tpu.memory_space<vmem>>, vector<1x2x16xf32>
    %4 = vector.shape_cast %3 : vector<1x2x16xf32> to vector<2x16xf32>
    %c0_3 = arith.constant 0 : index
    %c0_4 = arith.constant 0 : index
    %5 = vector.load %arg10[%c0_3, %c0_4] : memref<2x32xf32, #tpu.memory_space<vmem>>, vector<2x32xf32>
    %c0_5 = arith.constant 0 : index
    %c0_6 = arith.constant 0 : index
    %6 = vector.load %arg11[%c0_5, %c0_6] : memref<2x32xf32, #tpu.memory_space<vmem>>, vector<2x32xf32>
    %7 = tpu.concatenate %4, %5 in 1 : vector<2x16xf32>, vector<2x32xf32> -> vector<2x48xf32>
    %c0_7 = arith.constant 0 : index
    %c0_8 = arith.constant 0 : index
    %8 = vector.load %arg4[%c0_7, %c0_8] : memref<48x128xf32, #tpu.memory_space<vmem>>, vector<48x128xf32>
    %cst = arith.constant dense<0.000000e+00> : vector<2x128xf32>
    %9 = tpu.matmul %7, %8, %cst {dimension_numbers = #tpu.dot_dimension_numbers<[1], [0], [0], [1], [0, 0, 1, 1], [], []>} : vector<2x48xf32>, vector<48x128xf32>, vector<2x128xf32> -> vector<2x128xf32>
    %c0_9 = arith.constant 0 : index
    %c0_10 = arith.constant 0 : index
    %10 = vector.load %arg5[%c0_9, %c0_10] : memref<1x128xf32, #tpu.memory_space<vmem>>, vector<1x128xf32>
    %11 = vector.broadcast %10 : vector<1x128xf32> to vector<2x128xf32>
    %12 = arith.addf %9, %11 : vector<2x128xf32>
    %13 = arith.negf %12 : vector<2x128xf32>
    %14 = math.exp %13 : vector<2x128xf32>
    %cst_11 = arith.constant 1.000000e+00 : f32
    %15 = vector.broadcast %cst_11 : f32 to vector<2x128xf32>
    %16 = arith.addf %15, %14 : vector<2x128xf32>
    %17 = arith.divf %15, %16 : vector<2x128xf32>
    %18 = math.tanh %12 : vector<2x128xf32>
    %19 = vector.extract_strided_slice %17 {offsets = [0, 0], sizes = [2, 32], strides = [1, 1]} : vector<2x128xf32> to vector<2x32xf32>
    %20 = vector.extract_strided_slice %17 {offsets = [0, 32], sizes = [2, 32], strides = [1, 1]} : vector<2x128xf32> to vector<2x32xf32>
    %21 = vector.extract_strided_slice %17 {offsets = [0, 96], sizes = [2, 32], strides = [1, 1]} : vector<2x128xf32> to vector<2x32xf32>
    %22 = vector.extract_strided_slice %18 {offsets = [0, 64], sizes = [2, 32], strides = [1, 1]} : vector<2x128xf32> to vector<2x32xf32>
    %23 = arith.mulf %20, %6 : vector<2x32xf32>
    %24 = arith.mulf %19, %22 : vector<2x32xf32>
    %25 = arith.addf %23, %24 : vector<2x32xf32>
    %26 = math.tanh %25 : vector<2x32xf32>
    %27 = arith.mulf %21, %26 : vector<2x32xf32>
    %c0_12 = arith.constant 0 : index
    %c0_13 = arith.constant 0 : index
    %28 = vector.load %arg6[%c0_12, %c0_13] : memref<32x16xf32, #tpu.memory_space<vmem>>, vector<32x16xf32>
    %cst_14 = arith.constant dense<0.000000e+00> : vector<2x16xf32>
    %29 = tpu.matmul %27, %28, %cst_14 {dimension_numbers = #tpu.dot_dimension_numbers<[1], [0], [0], [1], [0, 0, 1, 1], [], []>} : vector<2x32xf32>, vector<32x16xf32>, vector<2x16xf32> -> vector<2x16xf32>
    %c0_15 = arith.constant 0 : index
    %c0_16 = arith.constant 0 : index
    %30 = vector.load %arg7[%c0_15, %c0_16] : memref<1x16xf32, #tpu.memory_space<vmem>>, vector<1x16xf32>
    %31 = vector.broadcast %30 : vector<1x16xf32> to vector<2x16xf32>
    %32 = arith.addf %29, %31 : vector<2x16xf32>
    %33 = arith.addf %32, %4 : vector<2x16xf32>
    %c0_17 = arith.constant 0 : index
    %c0_18 = arith.constant 0 : index
    %c0_19 = arith.constant 0 : index
    %34 = vector.load %arg8[%c0_17, %c0_18, %c0_19] : memref<1x2x16xf32, #tpu.memory_space<vmem>>, vector<1x2x16xf32>
    %35 = vector.shape_cast %34 : vector<1x2x16xf32> to vector<2x16xf32>
    %36 = vector.shape_cast %33 : vector<2x16xf32> to vector<1x2x16xf32>
    tpu.vector_store %arg8[%c0_17, %c0_18, %c0_19], %36 {strides = array<i32>} : memref<1x2x16xf32, #tpu.memory_space<vmem>>, vector<1x2x16xf32>,
    %c0_20 = arith.constant 0 : index
    %c0_21 = arith.constant 0 : index
    %37 = vector.load %arg10[%c0_20, %c0_21] : memref<2x32xf32, #tpu.memory_space<vmem>>, vector<2x32xf32>
    tpu.vector_store %arg10[%c0_20, %c0_21], %27 {strides = array<i32>} : memref<2x32xf32, #tpu.memory_space<vmem>>, vector<2x32xf32>,
    %c0_22 = arith.constant 0 : index
    %c0_23 = arith.constant 0 : index
    %38 = vector.load %arg11[%c0_22, %c0_23] : memref<2x32xf32, #tpu.memory_space<vmem>>, vector<2x32xf32>
    tpu.vector_store %arg11[%c0_22, %c0_23], %25 {strides = array<i32>} : memref<2x32xf32, #tpu.memory_space<vmem>>, vector<2x32xf32>,
    %c7_i32 = arith.constant 7 : i32
    %39 = arith.cmpi eq, %arg0, %c7_i32 : i32
    %40 = arith.extui %39 : i1 to i32
    %c0_i32_24 = arith.constant 0 : i32
    %41 = arith.cmpi ne, %40, %c0_i32_24 : i32
    scf.if %41 {
      %42 = tpu.concatenate %27, %25 in 1 : vector<2x32xf32>, vector<2x32xf32> -> vector<2x64xf32>
      %c0_25 = arith.constant 0 : index
      %c0_26 = arith.constant 0 : index
      %43 = vector.load %arg9[%c0_25, %c0_26] : memref<2x64xf32, #tpu.memory_space<vmem>>, vector<2x64xf32>
      tpu.vector_store %arg9[%c0_25, %c0_26], %42 {strides = array<i32>} : memref<2x64xf32, #tpu.memory_space<vmem>>, vector<2x64xf32>,
    } else {
    }
    return
  }
  func.func @transform_0(%arg0: i32) -> (i32, i32, i32) {
    %c0_i32 = arith.constant 0 : i32
    %c0_i32_0 = arith.constant 0 : i32
    %c0_i32_1 = arith.constant 0 : i32
    return %arg0, %c0_i32, %c0_i32_0 : i32, i32, i32
  }
  func.func @transform_1(%arg0: i32) -> (i32, i32) {
    %c0_i32 = arith.constant 0 : i32
    %c0_i32_0 = arith.constant 0 : i32
    %c0_i32_1 = arith.constant 0 : i32
    return %c0_i32, %c0_i32_0 : i32, i32
  }
  func.func @transform_2(%arg0: i32) -> (i32, i32) {
    %c0_i32 = arith.constant 0 : i32
    %c0_i32_0 = arith.constant 0 : i32
    %c0_i32_1 = arith.constant 0 : i32
    return %c0_i32, %c0_i32_0 : i32, i32
  }
  func.func @transform_3(%arg0: i32) -> (i32, i32) {
    %c0_i32 = arith.constant 0 : i32
    %c0_i32_0 = arith.constant 0 : i32
    %c0_i32_1 = arith.constant 0 : i32
    return %c0_i32, %c0_i32_0 : i32, i32
  }
  func.func @transform_4(%arg0: i32) -> (i32, i32) {
    %c0_i32 = arith.constant 0 : i32
    %c0_i32_0 = arith.constant 0 : i32
    %c0_i32_1 = arith.constant 0 : i32
    return %c0_i32, %c0_i32_0 : i32, i32
  }
  func.func @transform_5(%arg0: i32) -> (i32, i32) {
    %c0_i32 = arith.constant 0 : i32
    %c0_i32_0 = arith.constant 0 : i32
    %c0_i32_1 = arith.constant 0 : i32
    return %c0_i32, %c0_i32_0 : i32, i32
  }
  func.func @transform_6(%arg0: i32) -> (i32, i32) {
    %c0_i32 = arith.constant 0 : i32
    %c0_i32_0 = arith.constant 0 : i32
    %c0_i32_1 = arith.constant 0 : i32
    return %c0_i32, %c0_i32_0 : i32, i32
  }
  func.func @transform_7(%arg0: i32) -> (i32, i32, i32) {
    %c0_i32 = arith.constant 0 : i32
    %c0_i32_0 = arith.constant 0 : i32
    %c0_i32_1 = arith.constant 0 : i32
    return %arg0, %c0_i32, %c0_i32_0 : i32, i32, i32
  }
  func.func @transform_8(%arg0: i32) -> (i32, i32) {
    %c0_i32 = arith.constant 0 : i32
    %c0_i32_0 = arith.constant 0 : i32
    %c0_i32_1 = arith.constant 0 : i32
    return %c0_i32, %c0_i32_0 : i32, i32
  }
}

</mosaic_0001>

<bundles_post_ra>
// kernel: tpu_custom_call.1
= control target key start
LH: loop header
LB: loop body
LE: loop exit
PB: predicated region body
PF: predicated region fallthrough
CT: control target
= control target key end

     0   :  { %14 = vsyncpa [#allocation5], 0  ;;  %s1172_s0 = inlined_call_operand.hbm [shape: f32[8,2,16], index: 0, kind: input, shape index: {}]   ;;  %s1173_s1 = inlined_call_operand.vmem [shape: f32[2,32], index: 1, kind: input, shape index: {}]   ;;  %s1174_s2 = inlined_call_operand.vmem [shape: f32[2,32], index: 2, kind: input, shape index: {}]   ;;  %s1175_s3 = inlined_call_operand.vmem [shape: f32[48,128], index: 3, kind: input, shape index: {}]   ;;  %s1176_s4 = inlined_call_operand.vmem [shape: f32[1,128], index: 4, kind: input, shape index: {}]   ;;  %s1177_s5 = inlined_call_operand.vmem [shape: f32[32,16], index: 5, kind: input, shape index: {}]   ;;  %s1178_s6 = inlined_call_operand.vmem [shape: f32[1,16], index: 6, kind: input, shape index: {}]   ;;  %s1179_s7 = inlined_call_operand.hbm [shape: f32[8,2,16], index: 7, kind: output, shape index: {0}]   ;;  %s1180_s8 = inlined_call_operand.hbm [shape: f32[2,64], index: 8, kind: output, shape index: {1}]  }
   0x1   :  { %16 = vsyncpa [#allocation5 + $0x1], 0 }
   0x2   :  { %17 = vsyncpa [#allocation6], 0 }
   0x3   :  { %19 = vsyncpa [#allocation6 + $0x1], 0 }
   0x4   :  { %20 = vsyncpa [#allocation9], 0  ;;  %s966_s27 = smov 0   ;;  %s968_s28 = smov 0  }
   0x5   :  { %s970_s29 = smov 0   ;;  %s972_s30 = smov 0  }
   0x6 LB: > { %s987_s9 = sadd.s32 4294967295, %s910_s30   ;;  %s664_s10 = sadd.s32 4294967294, %s910_s30   ;;  %s910_s30 = sphi %s972_s30, %s1203_s30   ;;  %s906_s29 = sphi %s970_s29, %s1202_s29   ;;  %s902_s28 = sphi %s968_s28, %s1201_s28   ;;  %s898_s27 = sphi %s966_s27, %s1200_s27  }
   0x7   : > { %s991_s11 = sadd.s32 1, %s910_s30   ;;  %s33_s12 = sadd.s32 1, %s906_s29 }
   0x8   : > { %s30_s13 = ssub.s32 %s910_s30, %s991_s11  ;;  %p40_p0 = scmp.ne.s32.totalorder %s906_s29, %s902_s28 }
   0x9   : > { %p31_p1 = scmp.eq.s32.totalorder %s30_s13, 0  ;;  %p41_p2 = scmp.eq.s32.totalorder %s910_s30, 0 }
   0xa   : > { %p46_p3 = scmp.ne.s32.totalorder %s902_s28, %s898_s27  ;;  %p47_p4 = scmp.eq.s32.totalorder %s987_s9, 0 }
   0xb   : > { %s1003_s14 = scalar_select %p31_p1, %s906_s29, %s33_s12  }
   0xc   : > { %p1005_p5 = por %p41_p2, %p40_p0  ;;  %p1009_p6 = por %p47_p4, %p46_p3 }
   0xd   : > { %1184 = sst [smem:[#allocation13_spill]] %s1003_s14  ;;  %p1181_p7 = scmp.eq.s32.totalorder %s987_s9, 7 }
   0xe   : > { %s1186_s16 = scalar_select %p1009_p6, 1, 0 }
   0xf   : > { %p202_p8 = scmp.eq.s32.totalorder %s664_s10, 7  ;;  %p739_p9 = scmp.lt.s32.totalorder %s910_s30, 8 }
  0x10   : > { %p1017_p10 = por %p1181_p7, %p40_p0  ;;  %s261_s19 = sand.u32 1, %s906_s29  }
  0x11   : > { %p1021_p11 = por %p202_p8, %p46_p3  ;;  %s668_s20 = sshll.u32 %s910_s30, 5 }
  0x12   : > { %s1187_s17 = scalar_select %p1017_p10, 1, 0 }
  0x13   : > { %s1188_s18 = scalar_select %p1021_p11, 1, 0 }
  0x14   : > { %s667_s21 = sshll.u32 %s261_s19, 1  ;;  %s1030_s24 = scalar_lea.hbm %s1172_s0, %s668_s20 }
  0x15   : > { %s265_s25 = scalar_lea.vmem [#allocation4], %s667_s21  ;;  %p1034_p12 = pnand %p739_p9, %p1005_p5 }
  0x16   : > { %s272_s26 = sshll.u32 %s265_s25, 4  ;;  %s262_s12 = scalar_lea.sflag [#allocation5], %s261_s19  ;;  %s1038_s26 = int_to_ptr.vmem [resolvable:$true] %s272_s26 }
  0x17   : > { %s790_s13 = scalar_lea.hbm %s1030_s24, 32  ;;  %p792_p2 = pneg %p1034_p12 }
  0x18   : > { %p791_p1 = scmp.ne.s32.totalorder %s1030_s24, %s790_s13  ;;  %s795_s15 = scalar_lea.hbm %s1172_s0, 256 }
  0x19   : > { %p796_p5 = scmp.lt.s32.totalorder %s1030_s24, %s1172_s0  ;;  %p797_p8 = scmp.lt.s32.totalorder %s795_s15, %s790_s13 }
  0x1a   : > { %p793_p3 = pnand %p792_p2, %p791_p1 }
  0x1b   : > { %p798_p9 = por %p797_p8, %p796_p5 }
  0x1c   : > { %p794_p4 = pneg %p793_p3 }
  0x1e   : > { %p799_p7 = pnand %p798_p9, %p794_p4 }
  0x20   : > { %802 = shalt.err (!%p799_p7)
}
  0x21   : > { %s803_s19 = scalar_lea.vmem %s1038_s26, 32  ;;  %s912_s25 = smov [#allocation4]  }
  0x22   : > { %p804_p13 = scmp.ne.s32.totalorder %s1038_s26, %s803_s19  ;;  %s808_s14 = sshll.u32 %s912_s25, 4  ;;  %s809_s14 = int_to_ptr.vmem [resolvable:$false] %s808_s14 }
  0x23   : > { %s810_s20 = scalar_lea.vmem %s809_s14, 64  ;;  %p811_p3 = scmp.lt.s32.totalorder %s1038_s26, %s809_s14 }
  0x24   : > { %p806_p0 = pnand %p804_p13, %p792_p2  ;;  %p812_p11 = scmp.lt.s32.totalorder %s810_s20, %s803_s19 }
  0x26   : > { %p807_p1 = pneg %p806_p0  ;;  %p813_p10 = por %p812_p11, %p811_p3 }
  0x28   : > { %p814_p6 = pnand %p813_p10, %p807_p1 }
  0x2a   : > { %817 = shalt.err (!%p814_p6)
}
  0x2b   : > { %734 = dma.hbm_to_vmem [thread:$0]  (!%p1034_p12), %s1030_s24, 32, %s1038_s26, %s262_s12  }
  0x2c   : > { %p1190_p7 = scmp.lt.s32.totalorder %s910_s30, 9  ;;  %p1191_p4 = scmp.ge.s32.totalorder %s910_s30, 1 }
  0x2e   : > { %p278_p13 = pnand %p1191_p4, %p1190_p7 }
  0x2f   : > { %s1065_s13 = sand.u32 (!%p278_p13), 1, %s902_s28   ;;  %p1192_p6 = scmp.ne.s32.totalorder (!%p278_p13), %s1186_s16, 0 }
  0x30   : > { %281 = sbr.rel (%p278_p13) target bundleno = 1117 (0x45d), region = 48  ;;  %s670_s14 = sshll.u32 (!%p278_p13), %s1065_s13, 1 }
  0x31   : > { %s284_s21 = scalar_lea.sflag (!%p278_p13), [#allocation5], %s1065_s13  ;;  %s1069_s15 = scalar_lea.vmem (!%p278_p13), [#allocation4], %s670_s14 }
  0x35   : > { %885 = dma.done.wait (%p1192_p6), %s284_s21, 32  }
  0x36   : > { %887 = vsyncadd (%p1192_p6), %s284_s21, 4294967264  ;;  %s1075_s24 = scalar_lea.vmem [#allocation7], %s670_s14  ;;  %p672_p10 = scmp.ne.s32.totalorder %s987_s9, 0 }
  0x38   : > { %323 = sbr.rel (%p672_p10) target bundleno = 64 (0x40), region = 56 }
  0x3d   : > { %v324_v0 = vld [vmem:[%s1173_s1] sm:$0x3]  ;;  %vm325_vm0 = vcmask 254976  }
  0x3e   : > { %v327_v1 = vld [vmem:[%s1174_s2] sm:$0x3]  ;;  %326 = vst.msk [vmem:[#allocation2] sm:$0x3] %vm325_vm0, %v324_v0 }
  0x3f   : > { %328 = vst.msk [vmem:[#allocation3] sm:$0x3] %vm325_vm0, %v327_v1 }
  0x40 PF: > { %v343_v3 = vld [vmem:[%s1175_s3 + $0x28] sm:$0xff]  ;;  %s913_s19 = smov 16   ;;  %v914_v4 = vmov 0.0   ;;  %v342_v5 = vld [vmem:[%s1175_s3 + $0x20] sm:$0xff]  ;;  %vm915_vm1 = vmmov 0   ;;  %v341_v7 = vld [vmem:[%s1175_s3 + $0x18] sm:$0xff] }
  0x41   : > { %697 = vmatprep.subr.mxu0 %v914_v4  ;;  %709 = vmatprep.mubr.msk.f32.mxu0 %vm915_vm1, %v914_v4  ;;  %s916_s26 = smov 32   ;;  %v340_v8 = vld [vmem:[%s1175_s3 + $0x10] sm:$0xff]  ;;  %v339_v9 = vld [vmem:[%s1175_s3 + $0x8] sm:$0xff]  ;;  %v338_v10 = vld [vmem:[%s1175_s3] sm:$0xff]  ;;  %vm336_vm2 = vcmask 130048   ;;  %vm351_vm3 = vcmask 392192  }
  0x42   : > { %698 = vmatpush3.msra.mxu0 %v343_v3  ;;  %712 = vmatprep.subr.mxu1 %v914_v4  ;;  %v329_v11 = vld [vmem:[%s1069_s15] sm:$0x3]  ;;  %v673_v14 = vld [vmem:[%s1176_s4] ss:$0 sm:$0xff]  ;;  %s917_s14 = smov 64   ;;  %v456_v29 = vld [vmem:[%s1177_s5 + $0x18] sm:$0xff] }
  0x43   : > { %699 = vmatprep.subr.mxu0 %v914_v4  ;;  %720 = vmatprep.mubr.msk.f32.mxu1 %vm915_vm1, %v914_v4  ;;  %v455_v30 = vld [vmem:[%s1177_s5 + $0x10] sm:$0xff]  ;;  %v454_v31 = vld [vmem:[%s1177_s5 + $0x8] sm:$0xff]  ;;  %v453_v32 = vld [vmem:[%s1177_s5] sm:$0xff]  ;;  %s918_s25 = smov 96   ;;  %vm544_vm4 = vcmask 254976   ;;  %vm467_vm5 = vcmask 261120  }
  0x44   : > { %700 = vmatpush3.msra.mxu0 %v342_v5  ;;  %713 = vmatpush3.msra.mxu1 %v456_v29  ;;  %v676_v38 = vld [vmem:[%s1178_s6] ss:$0 sm:$0xff]  ;;  %vm541_vm6 = vcmask 123904   ;;  %p678_p11 = scmp.ne.s32.totalorder %s987_s9, 7 }
  0x45   : > { %v330_v2 = vld [vmem:[#allocation2] sm:$0x3]  ;;  %701 = vmatprep.subr.mxu0 %v914_v4  ;;  %714 = vmatprep.subr.mxu1 %v914_v4 }
  0x46   : > { %333 = vrot.lane.b32.xlu0 %v330_v2, %s913_s19  ;;  %v331_v6 = vld [vmem:[#allocation3] sm:$0x3]  ;;  %702 = vmatpush3.msra.mxu0 %v341_v7 }
  0x47   : > { %433 = vrot.lane.b32.xlu1 %v331_v6, %s916_s26  ;;  %703 = vmatprep.subr.mxu0 %v914_v4 }
  0x48   : > { %704 = vmatpush3.msra.mxu0 %v340_v8  ;;  %715 = vmatpush3.msra.mxu1 %v455_v30 }
  0x49   : > { %705 = vmatprep.subr.mxu0 %v914_v4  ;;  %716 = vmatprep.subr.mxu1 %v914_v4 }
  0x4a   : > { %706 = vmatpush3.msra.mxu0 %v339_v9  ;;  %717 = vmatpush3.msra.mxu1 %v454_v31 }
  0x4b   : > { %707 = vmatprep.subr.mxu0 %v914_v4  ;;  %718 = vmatprep.subr.mxu1 %v914_v4 }
  0x4c   : > { %708 = vmatpush3.msra.mxu0 %v338_v10  ;;  %719 = vmatpush3.msra.mxu1 %v453_v32 }
  0xb8   : > { %v334_v12 = vpop.permute.xlu0 %333 }
  0xb9   : > { %v337_v13 = vsel %vm336_vm2, %v329_v11, %v334_v12  ;;  %v434_v25 = vpop.permute.xlu1 %433 }
  0xba   : > { %710 = vmatmul.mubr.msk.f32.vlgmr.msra.gmra.mxu0 %vm351_vm3, %v337_v13 }
 0x17a   : > { %v421_v15 = vpop.f32.mrf.mxu0 }
 0x17b   : > { %v422_v16 = vadd.f32 %v673_v14, %v421_v15 }
 0x17c   : > { %v711_v17 = vpop.f32.mrf.mxu0 }
 0x17d   : > { %782 = vtanh.f32 %v422_v16  ;;  %v675_v19 = vmul.f32 -1.442695, %v422_v16 }
 0x17f   : > { %784 = vpow2.f32 %v675_v19 }
 0x18a   : > { %v783_v18 = vpop.eup %782 }
 0x18b   : > { %438 = vrot.lane.b32.xlu0 %v783_v18, %s917_s14 }
 0x18c   : > { %v785_v20 = vpop.eup %784 }
 0x18d   : > { %v428_v21 = vadd.f32 1.0, %v785_v20 }
 0x18f   : > { %786 = vrcp.f32 %v428_v21 }
 0x19c   : > { %v787_v22 = vpop.eup %786 }
 0x19d   : > { %v436_v26 = vmul.f32 %v787_v22, %v434_v25 }
 0x1fd   : > { %v439_v23 = vpop.permute.xlu0 %438 }
 0x1fe   : > { %v441_v24 = vmul.f32 %v787_v22, %v439_v23 }
 0x200   : > { %443 = vrot.lane.b32.xlu1 %v441_v24, %s916_s26 }
 0x272   : > { %v444_v27 = vpop.permute.xlu1 %443 }
 0x273   : > { %v446_v28 = vadd.f32 %v444_v27, %v436_v26 }
 0x275   : > { %788 = vtanh.f32 %v446_v28 }
 0x282   : > { %v789_v33 = vpop.eup %788 }
 0x283   : > { %449 = vrot.lane.b32.xlu0 %v789_v33, %s917_s14 }
 0x287   : > { %547 = vrot.lane.b32.xlu0 %v446_v28, %s918_s25 }
 0x2f5   : > { %v450_v34 = vpop.permute.xlu0 %449 }
 0x2f6   : > { %v452_v35 = vmul.f32 %v787_v22, %v450_v34 }
 0x2f8   : > { %465 = vrot.lane.b32.xlu1 %v452_v35, %s916_s26 }
 0x2f9   : > { %v548_v36 = vpop.permute.xlu0 %547 }
 0x2fa   : > { %550 = vst.msk [vmem:[#allocation3] sm:$0x3] %vm544_vm4, %v548_v36 }
 0x36a   : > { %v466_v37 = vpop.permute.xlu1 %465 }
 0x36b   : > { %545 = vst.msk [vmem:[#allocation2] sm:$0x3] %vm544_vm4, %v466_v37  ;;  %721 = vmatmul.mubr.msk.f32.vlgmr.msra.gmra.mxu1 %vm467_vm5, %v466_v37 }
 0x42b   : > { %v536_v39 = vpop.f32.mrf.mxu1 }
 0x42c   : > { %v537_v40 = vadd.f32 %v676_v38, %v536_v39  ;;  %554 = sbr.rel (%p678_p11) target bundleno = 1075 (0x433), region = 60 }
 0x42d   : > { %v722_v41 = vpop.f32.mrf.mxu1 }
 0x42e   : > { %v540_v42 = vadd.f32 %v537_v40, %v329_v11 }
 0x430   : > { %542 = vst.msk [vmem:[%s1075_s24] sm:$0x3] %vm541_vm6, %v540_v42 }
 0x431   : > { %v555_v43 = vsel %vm467_vm5, %v466_v37, %v446_v28  ;;  %vm556_vm7 = vcmask 517120  }
 0x432   : > { %557 = vst.msk [vmem:[#allocation8] sm:$0x3] %vm556_vm7, %v555_v43 }
 0x433 PF: > { %s680_s26 = sshll.u32 %s987_s9, 5  ;;  %s572_s12 = sshll.u32 %s1075_s24, 4  ;;  %s573_s12 = int_to_ptr.vmem [resolvable:$true] %s572_s12 }
 0x434   : > { %s570_s10 = scalar_lea.hbm %s1179_s7, %s680_s26  ;;  %s559_s22 = scalar_lea.sflag [#allocation6], %s1065_s13 }
 0x435   : > { %s818_s16 = scalar_lea.vmem %s573_s12, 32  ;;  %p1193_p0 = scmp.ne.s32.totalorder %s1187_s17, 0 }
 0x436   : > { %p819_p12 = scmp.ne.s32.totalorder %s573_s12, %s818_s16  ;;  %s919_s23 = smov [#allocation7]  }
 0x437   : > { %s822_s19 = sshll.u32 %s919_s23, 4  ;;  %s823_s19 = int_to_ptr.vmem [resolvable:$false] %s822_s19 }
 0x438   : > { %p820_p2 = pnand %p819_p12, %p1193_p0  ;;  %s824_s25 = scalar_lea.vmem %s823_s19, 64 }
 0x439   : > { %p825_p8 = scmp.lt.s32.totalorder %s573_s12, %s823_s19  ;;  %p826_p9 = scmp.lt.s32.totalorder %s824_s25, %s818_s16 }
 0x43a   : > { %p821_p5 = pneg %p820_p2 }
 0x43b   : > { %p827_p1 = por %p826_p9, %p825_p8 }
 0x43d   : > { %p828_p3 = pnand %p827_p1, %p821_p5 }
 0x43f   : > { %831 = shalt.err (!%p828_p3)
}
 0x440   : > { %s832_s20 = scalar_lea.hbm %s570_s10, 32  ;;  %s836_s15 = scalar_lea.hbm %s1179_s7, 256 }
 0x441   : > { %p833_p7 = scmp.ne.s32.totalorder %s570_s10, %s832_s20  ;;  %p837_p6 = scmp.lt.s32.totalorder %s570_s10, %s1179_s7 }
 0x442   : > { %p838_p10 = scmp.lt.s32.totalorder %s836_s15, %s832_s20 }
 0x443   : > { %p834_p4 = pnand %p833_p7, %p1193_p0 }
 0x444   : > { %p839_p11 = por %p838_p10, %p837_p6 }
 0x445   : > { %p835_p13 = pneg %p834_p4 }
 0x447   : > { %p840_p12 = pnand %p839_p11, %p835_p13 }
 0x449   : > { %843 = shalt.err (!%p840_p12)
}
 0x44a   : > { %725 = dma.vmem_to_hbm [thread:$0]  (%p1193_p0), %s573_s12, 32, %s570_s10, %s559_s22  }
 0x44b   : > { %s920_s21 = smov [#allocation8]   ;;  %p1194_p5 = scmp.eq.s32.totalorder %s987_s9, 7 }
 0x44c   : > { %s583_s16 = sshll.u32 %s920_s21, 4  ;;  %s584_s16 = int_to_ptr.vmem [resolvable:$true] %s583_s16 }
 0x44d   : > { %s844_s23 = scalar_lea.vmem %s584_s16, 32  ;;  %p851_p1 = scmp.lt.s32.totalorder %s584_s16, %s584_s16 }
 0x44e   : > { %p845_p2 = scmp.ne.s32.totalorder %s584_s16, %s844_s23  ;;  %p852_p3 = scmp.lt.s32.totalorder %s844_s23, %s844_s23 }
 0x450   : > { %p846_p8 = pnand %p845_p2, %p1194_p5  ;;  %p853_p7 = por %p852_p3, %p851_p1 }
 0x452   : > { %p847_p9 = pneg %p846_p8 }
 0x454   : > { %p854_p4 = pnand %p853_p7, %p847_p9 }
 0x456   : > { %857 = shalt.err (!%p854_p4)
}
 0x457   : > { %p1195_p13 = pmov %p1194_p5  ;;  %p1196_p0 = pmov %p1194_p5 }
 0x459   : > { %727 = dma.vmem_to_hbm [thread:$0]  (%p1195_p13), %s584_s16, 32, %s1180_s8, [#allocation9]  }
 0x45a   : > { %889 = dma.done.wait (%p1196_p0), [#allocation9], 32   ;;  %p1197_p6 = pmov %p1196_p0 }
 0x45c   : > { %891 = vsyncadd (%p1197_p6), [#allocation9], 4294967264 }
 0x45d PF: > { %p742_p10 = scmp.ge.s32.totalorder %s910_s30, 2  ;;  %s599_s17 = sand.u32 1, %s898_s27  }
 0x45e   : > { %p1198_p11 = scmp.ne.s32.totalorder %s1188_s18, 0  ;;  %s600_s10 = scalar_lea.sflag [#allocation6], %s599_s17 }
 0x460   : > { %p736_p12 = pnand %p742_p10, %p1198_p11 }
 0x462   : > { %p737_p2 = pneg %p736_p12 }
 0x464   : > { %893 = dma.done.wait (%p737_p2), %s600_s10, 32  }
 0x465   : > { %895 = vsyncadd (%p737_p2), %s600_s10, 4294967264  ;;  %s1199_s12 = sld [smem:[#allocation13_spill]]  ;;  %p23_p5 = scmp.ge.s32.totalorder %s991_s11, 10  }
 0x466   : > { %s1200_s27 = smov %s902_s28  ;;  %s1201_s28 = smov %s906_s29 }
 0x467   : > { %s1203_s30 = smov %s991_s11  ;;  %25 = sbr.rel (!%p23_p5) target bundleno = 6 (0x6), region = 109 }
 0x46b   : > { %s1202_s29 = smov %s1199_s12 }
 0x46c   :  { %605 = vsyncpa [#allocation5], 1 }
 0x46d   :  { %607 = vsyncpa [#allocation5 + $0x1], 1 }
 0x46e   :  { %608 = vsyncpa [#allocation6], 1 }
 0x46f   :  { %610 = vsyncpa [#allocation6 + $0x1], 1 }
 0x470   :  { %611 = vsyncpa [#allocation9], 1 }

</bundles_post_ra>
